<compile_context>
chip_gen: v5e
topology: v5e:2x2
jax: 0.10.0
libtpu: 0.0.40
codegen_flags: <defaults>
</compile_context>

<pallas_src>
import jax
import jax.numpy as jnp
from jax.experimental import pallas as pl
from jax.experimental.pallas import tpu as pltpu


def _round_up(n, m):
    return ((n + m - 1) // m) * m


def rbf_kernel_gather(x_ref, rep_ref, c_ref, w_ref, b_ref, o_ref):
    """Compact layout: per-centroid stride D (no per-centroid lane padding)."""
    # x_ref:   (TB, Dp)   batch tile of inputs
    # rep_ref: (Dp, K)    replicate+scale matrix: rep[d, k*D+d] = 1/(sqrt(2)*v_d)
    # c_ref:   (1, K)     centers pre-scaled by inv, flattened k-major (stride D)
    # w_ref:   (K, Op)    expanded linear weight (padded rows/cols are zero)
    # b_ref:   (1, Op)    bias (padded with zero)
    # o_ref:   (TB, Op)
    # One MXU matmul both broadcasts x across centroids and folds in the
    # 1/(sqrt(2)*v) scaling -> lane-dense (TB, K) slab, no divides, no XLU work.
    xt = jnp.dot(x_ref[...], rep_ref[...], preferred_element_type=jnp.float32)
    diff = xt - c_ref[...]
    radial = jnp.exp(-(diff * diff))                       # EUP-bound hot path
    # Fused d-reduction + linear layer: one lane-dense MXU contraction.
    out = jnp.dot(radial, w_ref[...], preferred_element_type=jnp.float32)
    o_ref[...] = (out + b_ref[...]).astype(o_ref.dtype)


def rbf_kernel_tile(x_ref, inv_ref, c_ref, w_ref, b_ref, o_ref):
    """Fallback for large D: per-centroid stride Dp (lane-aligned vreg tiling)."""
    xs = x_ref[...] * inv_ref[...]                         # (TB, Dp)
    nc_rep = c_ref.shape[1] // x_ref.shape[1]              # NCp
    xt = jnp.tile(xs, (1, nc_rep))                         # (TB, NCp*Dp), lane-aligned copies
    diff = xt - c_ref[...]
    radial = jnp.exp(-(diff * diff))
    out = jnp.dot(radial, w_ref[...], preferred_element_type=jnp.float32)
    o_ref[...] = (out + b_ref[...]).astype(o_ref.dtype)


def rbf_forward(x, centers, variance, weight, bias):
    B, D = x.shape
    NC = centers.shape[0]
    O = weight.shape[0]
    # PyTorch's forward only broadcasts correctly when num_centroids == input_dim.
    assert NC == D, "RBF forward requires num_centroids == input_dim (PyTorch quirk)"

    f32 = jnp.float32
    x = x.astype(f32)
    centers = centers.astype(f32)
    variance = variance.astype(f32)
    weight = weight.astype(f32)
    bias = bias.astype(f32)

    Dp = _round_up(D, 128)       # lane axis of x
    Op = _round_up(O, 128)       # lane-dense output -> unmasked full vst
    inv = 1.0 / (jnp.sqrt(2.0).astype(f32) * variance)     # (NC,), NC == D

    # Compact flattened width (stride D): exp/MXU work ~ NC*D instead of
    # NC*round_up(D,128).  Requires a (Dp, K) replication matrix in VMEM.
    Kc = _round_up(NC * D, 128)
    rep_bytes = Dp * Kc * 4
    use_gather = rep_bytes <= (8 << 20)

    if use_gather:
        K = Kc
        # rep[d, k*D + d] = inv[d]; zero elsewhere and in padded rows/cols.
        rep_core = jnp.tile(jnp.diag(inv), (1, NC))                     # (D, NC*D)
        arg2 = jnp.zeros((Dp, K), f32).at[:D, :NC * D].set(rep_core)
        csf = jnp.zeros((1, K), f32).at[0, :NC * D].set(
            (centers * inv[None, :]).reshape(NC * D))
        w_exp = jnp.zeros((K, Op), f32).at[:NC * D, :O].set(
            jnp.broadcast_to(weight.T[:, None, :], (NC, D, O)).reshape(NC * D, O))
        kernel = rbf_kernel_gather
        extra_flops = 2 * Dp * K          # per batch row: replication matmul
    else:
        # Lane-aligned fallback: per-centroid stride Dp (previously validated).
        NCp = _round_up(NC, 8)
        K = NCp * Dp
        inv_pad = jnp.ones((Dp,), f32).at[:D].set(inv)   # pad with 1.0: no inf/NaN
        arg2 = inv_pad.reshape(1, Dp)
        c_pad = jnp.zeros((NCp, Dp), f32).at[:NC, :D].set(centers)
        csf = (c_pad * arg2).reshape(1, K)
        w_exp = jnp.zeros((NCp, Dp, Op), f32).at[:NC, :D, :O].set(
            jnp.broadcast_to(weight.T[:, None, :], (NC, D, O))).reshape(K, Op)
        kernel = rbf_kernel_tile
        extra_flops = 2 * Dp              # per batch row: x * inv

    b2d = jnp.zeros((1, Op), f32).at[0, :O].set(bias)

    # Batch tile: multiple of 8, capped so the (TB, K) f32 intermediates stay
    # ~2 MiB -> comfortable in VMEM on v5e/v6e/v7x with double-buffer headroom.
    cap = max(8, min(512, (2 * 1024 * 1024 // (K * 4)) // 8 * 8))
    TB = min(cap, _round_up(B, 8))
    Bp = _round_up(B, TB)
    x_pad = jnp.zeros((Bp, Dp), f32).at[:B, :D].set(x)

    grid = (Bp // TB,)
    cost = pl.CostEstimate(
        flops=Bp * (2 * K * Op + 3 * K + extra_flops),
        transcendentals=Bp * K,
        bytes_accessed=4 * (Bp * Dp + arg2.size + K + K * Op + Op + Bp * Op),
    )

    out = pl.pallas_call(
        kernel,
        out_shape=jax.ShapeDtypeStruct((Bp, Op), f32),
        grid=grid,
        in_specs=[
            pl.BlockSpec((TB, Dp), lambda i: (i, 0)),      # x: tiled over batch, pipelined
            pl.BlockSpec(arg2.shape, lambda i: (0, 0)),    # rep / inv: resident
            pl.BlockSpec((1, K), lambda i: (0, 0)),        # scaled flat centers: resident
            pl.BlockSpec((K, Op), lambda i: (0, 0)),       # expanded weight: resident
            pl.BlockSpec((1, Op), lambda i: (0, 0)),       # bias: resident
        ],
        out_specs=pl.BlockSpec((TB, Op), lambda i: (i, 0)),
        compiler_params=pltpu.CompilerParams(
            dimension_semantics=("parallel",)),
        cost_estimate=cost,
    )(x_pad, arg2, csf, w_exp, b2d)

    return out[:B, :O]


def rbf_reference(x, centers, variance, weight, bias):
    diff = x[:, None, :] - centers[None, :, :]
    radial = jnp.exp(-(diff ** 2) / (2.0 * variance ** 2)[None, None, :])
    hidden = jnp.sum(radial, axis=2)
    return hidden @ weight.T + bias[None, :]


if __name__ == "__main__":
    # Small shapes consistent with the module. The PyTorch forward's
    # broadcasting requires num_centroids == input_dim.
    batch = 4
    input_dim = 16
    num_centroids = 16
    output_dim = 8
    hidden_dim = 32  # unused by the PyTorch forward (kept for interface parity)

    key = jax.random.PRNGKey(0)
    kx, kc, kw, kb, kv = jax.random.split(key, 5)

    x = jax.random.normal(kx, (batch, input_dim), dtype=jnp.float32)
    centers = jax.random.normal(kc, (num_centroids, input_dim), dtype=jnp.float32)
    weight = jax.random.normal(kw, (output_dim, num_centroids), dtype=jnp.float32) * 0.1
    bias = jax.random.normal(kb, (output_dim,), dtype=jnp.float32) * 0.1
    variance = 0.5 + jax.random.uniform(kv, (num_centroids,), dtype=jnp.float32)

    out = rbf_forward(x, centers, variance, weight, bias)
    out = jax.block_until_ready(out)

    ref = rbf_reference(x, centers, variance, weight, bias)
    assert out.shape == (batch, output_dim)
    assert jnp.allclose(out, ref, atol=1e-5, rtol=1e-5), "mismatch vs reference"

    print("KERNEL_OK")
</pallas_src>

<mosaic_0001>
module attributes {stable_mosaic.version = 11 : i64} {
  func.func @rbf_kernel_gather(%arg0: i32, %arg1: memref<8x128xf32, #tpu.memory_space<vmem>>, %arg2: memref<128x256xf32, #tpu.memory_space<vmem>>, %arg3: memref<1x256xf32, #tpu.memory_space<vmem>>, %arg4: memref<256x128xf32, #tpu.memory_space<vmem>>, %arg5: memref<1x128xf32, #tpu.memory_space<vmem>>, %arg6: memref<8x128xf32, #tpu.memory_space<vmem>>) attributes {dimension_semantics = [#tpu.dimension_semantics<parallel>], iteration_bounds = array<i64: 1>, scalar_prefetch = 0 : i64, scratch_operands = 0 : i64, tpu.core_type = #tpu.core_type<tc>, window_params = [{transform_indices = @transform_0, window_bounds = array<i64: 8, 128>}, {pipeline_mode = #tpu.pipeline_mode<synchronous>, transform_indices = @transform_1, window_bounds = array<i64: 128, 256>}, {pipeline_mode = #tpu.pipeline_mode<synchronous>, transform_indices = @transform_2, window_bounds = array<i64: 1, 256>}, {pipeline_mode = #tpu.pipeline_mode<synchronous>, transform_indices = @transform_3, window_bounds = array<i64: 256, 128>}, {pipeline_mode = #tpu.pipeline_mode<synchronous>, transform_indices = @transform_4, window_bounds = array<i64: 1, 128>}, {transform_indices = @transform_5, window_bounds = array<i64: 8, 128>}]} {
    %c0 = arith.constant 0 : index
    %c0_0 = arith.constant 0 : index
    %0 = vector.load %arg1[%c0, %c0_0] : memref<8x128xf32, #tpu.memory_space<vmem>>, vector<8x128xf32>
    %c0_1 = arith.constant 0 : index
    %c0_2 = arith.constant 0 : index
    %1 = vector.load %arg2[%c0_1, %c0_2] : memref<128x256xf32, #tpu.memory_space<vmem>>, vector<128x256xf32>
    %cst = arith.constant dense<0.000000e+00> : vector<8x256xf32>
    %2 = tpu.matmul %0, %1, %cst {dimension_numbers = #tpu.dot_dimension_numbers<[1], [0], [0], [1], [0, 0, 1, 1], [], []>} : vector<8x128xf32>, vector<128x256xf32>, vector<8x256xf32> -> vector<8x256xf32>
    %c0_3 = arith.constant 0 : index
    %c0_4 = arith.constant 0 : index
    %3 = vector.load %arg3[%c0_3, %c0_4] : memref<1x256xf32, #tpu.memory_space<vmem>>, vector<1x256xf32>
    %4 = vector.broadcast %3 : vector<1x256xf32> to vector<8x256xf32>
    %5 = arith.subf %2, %4 : vector<8x256xf32>
    %6 = arith.mulf %5, %5 : vector<8x256xf32>
    %cst_5 = arith.constant 0.000000e+00 : f32
    %7 = vector.broadcast %cst_5 : f32 to vector<8x256xf32>
    %8 = arith.subf %7, %6 : vector<8x256xf32>
    %9 = math.exp %8 : vector<8x256xf32>
    %c0_6 = arith.constant 0 : index
    %c0_7 = arith.constant 0 : index
    %10 = vector.load %arg4[%c0_6, %c0_7] : memref<256x128xf32, #tpu.memory_space<vmem>>, vector<256x128xf32>
    %cst_8 = arith.constant dense<0.000000e+00> : vector<8x128xf32>
    %11 = tpu.matmul %9, %10, %cst_8 {dimension_numbers = #tpu.dot_dimension_numbers<[1], [0], [0], [1], [0, 0, 1, 1], [], []>} : vector<8x256xf32>, vector<256x128xf32>, vector<8x128xf32> -> vector<8x128xf32>
    %c0_9 = arith.constant 0 : index
    %c0_10 = arith.constant 0 : index
    %12 = vector.load %arg5[%c0_9, %c0_10] : memref<1x128xf32, #tpu.memory_space<vmem>>, vector<1x128xf32>
    %13 = vector.broadcast %12 : vector<1x128xf32> to vector<8x128xf32>
    %14 = arith.addf %11, %13 : vector<8x128xf32>
    %c0_11 = arith.constant 0 : index
    %c0_12 = arith.constant 0 : index
    %15 = vector.load %arg6[%c0_11, %c0_12] : memref<8x128xf32, #tpu.memory_space<vmem>>, vector<8x128xf32>
    tpu.vector_store %arg6[%c0_11, %c0_12], %14 {strides = array<i32>} : memref<8x128xf32, #tpu.memory_space<vmem>>, vector<8x128xf32>,
    return
  }
  func.func @transform_0(%arg0: i32) -> (i32, i32) {
    %c0_i32 = arith.constant 0 : i32
    %c0_i32_0 = arith.constant 0 : i32
    return %arg0, %c0_i32 : i32, i32
  }
  func.func @transform_1(%arg0: i32) -> (i32, i32) {
    %c0_i32 = arith.constant 0 : i32
    %c0_i32_0 = arith.constant 0 : i32
    %c0_i32_1 = arith.constant 0 : i32
    return %c0_i32, %c0_i32_0 : i32, i32
  }
  func.func @transform_2(%arg0: i32) -> (i32, i32) {
    %c0_i32 = arith.constant 0 : i32
    %c0_i32_0 = arith.constant 0 : i32
    %c0_i32_1 = arith.constant 0 : i32
    return %c0_i32, %c0_i32_0 : i32, i32
  }
  func.func @transform_3(%arg0: i32) -> (i32, i32) {
    %c0_i32 = arith.constant 0 : i32
    %c0_i32_0 = arith.constant 0 : i32
    %c0_i32_1 = arith.constant 0 : i32
    return %c0_i32, %c0_i32_0 : i32, i32
  }
  func.func @transform_4(%arg0: i32) -> (i32, i32) {
    %c0_i32 = arith.constant 0 : i32
    %c0_i32_0 = arith.constant 0 : i32
    %c0_i32_1 = arith.constant 0 : i32
    return %c0_i32, %c0_i32_0 : i32, i32
  }
  func.func @transform_5(%arg0: i32) -> (i32, i32) {
    %c0_i32 = arith.constant 0 : i32
    %c0_i32_0 = arith.constant 0 : i32
    return %arg0, %c0_i32 : i32, i32
  }
}

</mosaic_0001>

<bundles_post_ra>
// kernel: tpu_custom_call.1
= control target key start
LH: loop header
LB: loop body
LE: loop exit
PB: predicated region body
PF: predicated region fallthrough
CT: control target
= control target key end

     0   :  { %10 = vsyncpa [#allocation3], 0  ;;  %s464_s0 = inlined_call_operand.hbm [shape: f32[8,128], index: 0, kind: input, shape index: {}]   ;;  %s465_s1 = inlined_call_operand.hbm [shape: f32[128,256], index: 1, kind: input, shape index: {}]   ;;  %s466_s2 = inlined_call_operand.hbm [shape: f32[1,256], index: 2, kind: input, shape index: {}]   ;;  %s467_s3 = inlined_call_operand.hbm [shape: f32[256,128], index: 3, kind: input, shape index: {}]   ;;  %s468_s4 = inlined_call_operand.vmem [shape: f32[1,128], index: 4, kind: input, shape index: {}]   ;;  %s469_s5 = inlined_call_operand.hbm [shape: f32[8,128], index: 5, kind: output, shape index: {}]  }
   0x1   :  { %11 = vsyncpa [#allocation6], 0 }
   0x2   :  { %12 = vsyncpa [#allocation9], 0  ;;  %s29_s20 = sshll.u32 %s465_s1, 4  ;;  %s30_s20 = int_to_ptr.hbm [resolvable:$true] %s29_s20 }
   0x3   :  { %13 = vsyncpa [#allocation4], 0  ;;  %s407_s21 = smov [#allocation5]   ;;  %s19_s25 = sshll.u32 %s464_s0, 4  ;;  %s20_s25 = int_to_ptr.hbm [resolvable:$true] %s19_s25 }
   0x4   :  { %s31_s22 = sshll.u32 %s407_s21, 4  ;;  %s408_s26 = smov 256   ;;  %s32_s22 = int_to_ptr.vmem [resolvable:$true] %s31_s22 }
   0x5   :  { %s409_s27 = smov 16   ;;  %s410_s28 = smov [#allocation2]  }
   0x6   :  { %37 = dma.hbm_to_vmem [thread:$0]  %s30_s20, 4096, %s32_s22, [#allocation6], %s408_s26, %s408_s26, %s409_s27  }
   0x7   :  { %s21_s29 = sshll.u32 %s410_s28, 4  ;;  %s43_s7 = sshll.u32 %s466_s2, 4  ;;  %s22_s29 = int_to_ptr.vmem [resolvable:$true] %s21_s29  ;;  %s44_s7 = int_to_ptr.hbm [resolvable:$true] %s43_s7 }
   0x8   :  { %24 = dma.hbm_to_vmem [thread:$0]  %s20_s25, 128, %s22_s29, [#allocation3]  }
   0x9   :  { %s53_s9 = sshll.u32 %s467_s3, 4  ;;  %s411_s10 = smov [#allocation7]   ;;  %s54_s9 = int_to_ptr.hbm [resolvable:$true] %s53_s9 }
   0xa   :  { %s45_s11 = sshll.u32 %s411_s10, 4  ;;  %s412_s0 = smov [#allocation8]   ;;  %s46_s11 = int_to_ptr.vmem [resolvable:$true] %s45_s11 }
   0xb   :  { %48 = dma.hbm_to_vmem [thread:$0]  %s44_s7, 32, %s46_s11, [#allocation6]  }
   0xc   :  { %s55_s12 = sshll.u32 %s412_s0, 4  ;;  %s413_s13 = smov 128   ;;  %s56_s12 = int_to_ptr.vmem [resolvable:$true] %s55_s12 }
   0xd   :  { %s414_s14 = smov 8  }
   0xe   :  { %61 = dma.hbm_to_vmem [thread:$0]  %s54_s9, 4096, %s56_s12, [#allocation9], %s413_s13, %s413_s13, %s414_s14  }
   0xf   :  { %399 = dma.done.wait [#allocation3], 128  }
  0x10   :  { %400 = vsyncadd [#allocation3], 4294967168 }
  0x11   :  { %401 = dma.done.wait [#allocation6], 4128  }
  0x12   :  { %402 = vsyncadd [#allocation6], 4294963168 }
  0x13   :  { %403 = dma.done.wait [#allocation9], 4096  }
  0x14   :  { %404 = vsyncadd [#allocation9], 4294963200  ;;  %v111_v0 = vld [vmem:[#allocation5 + $0xf0] sm:$0xff]  ;;  %v109_v1 = vld [vmem:[#allocation5 + $0xe0] sm:$0xff]  ;;  %s415_s15 = smov [#allocation10]   ;;  %s253_s19 = sshll.u32 %s469_s5, 4  ;;  %s254_s19 = int_to_ptr.hbm [resolvable:$true] %s253_s19 }
  0x15   :  { %v112_v2 = vld [vmem:[#allocation5 + $0xf8] sm:$0xff]  ;;  %113 = vmatpush.msra.mxu0 %v111_v0  ;;  %v110_v3 = vld [vmem:[#allocation5 + $0xe8] sm:$0xff]  ;;  %v107_v4 = vld [vmem:[#allocation5 + $0xd0] sm:$0xff]  ;;  %s251_s16 = sshll.u32 %s415_s15, 4  ;;  %s252_s16 = int_to_ptr.vmem [resolvable:$true] %s251_s16 }
  0x16   :  { %133 = vmatpush.msra.mxu1 %v112_v2  ;;  %v108_v5 = vld [vmem:[#allocation5 + $0xd8] sm:$0xff]  ;;  %v105_v6 = vld [vmem:[#allocation5 + $0xc0] sm:$0xff]  ;;  %v106_v7 = vld [vmem:[#allocation5 + $0xc8] sm:$0xff] }
  0x17   :  { %114 = vmatpush.msra.mxu0 %v109_v1  ;;  %v103_v8 = vld [vmem:[#allocation5 + $0xb0] sm:$0xff]  ;;  %v104_v9 = vld [vmem:[#allocation5 + $0xb8] sm:$0xff]  ;;  %v101_v10 = vld [vmem:[#allocation5 + $0xa0] sm:$0xff] }
  0x18   :  { %134 = vmatpush.msra.mxu1 %v110_v3  ;;  %v102_v11 = vld [vmem:[#allocation5 + $0xa8] sm:$0xff]  ;;  %v99_v12 = vld [vmem:[#allocation5 + $0x90] sm:$0xff]  ;;  %v100_v13 = vld [vmem:[#allocation5 + $0x98] sm:$0xff] }
  0x19   :  { %115 = vmatpush.msra.mxu0 %v107_v4  ;;  %v184_v14 = vld [vmem:[#allocation8 + $0x78] sm:$0xff]  ;;  %v183_v15 = vld [vmem:[#allocation8 + $0x70] sm:$0xff]  ;;  %v98_v18 = vld [vmem:[#allocation5 + $0x88] sm:$0xff] }
  0x1a   :  { %135 = vmatpush.msra.mxu1 %v108_v5  ;;  %v200_v16 = vld [vmem:[#allocation8 + $0xf8] sm:$0xff]  ;;  %205 = vmatpush.msra.mxu2 %v184_v14  ;;  %v199_v19 = vld [vmem:[#allocation8 + $0xf0] sm:$0xff]  ;;  %v182_v20 = vld [vmem:[#allocation8 + $0x68] sm:$0xff] }
  0x1b   :  { %116 = vmatpush.msra.mxu0 %v105_v6  ;;  %v97_v17 = vld [vmem:[#allocation5 + $0x80] sm:$0xff]  ;;  %225 = vmatpush.msra.mxu3 %v200_v16  ;;  %v198_v21 = vld [vmem:[#allocation8 + $0xe8] sm:$0xff]  ;;  %v96_v23 = vld [vmem:[#allocation5 + $0x78] sm:$0xff] }
  0x1c   :  { %136 = vmatpush.msra.mxu1 %v106_v7  ;;  %v95_v22 = vld [vmem:[#allocation5 + $0x70] sm:$0xff]  ;;  %206 = vmatpush.msra.mxu2 %v183_v15  ;;  %v181_v24 = vld [vmem:[#allocation8 + $0x60] sm:$0xff]  ;;  %v180_v28 = vld [vmem:[#allocation8 + $0x58] sm:$0xff] }
  0x1d   :  { %117 = vmatpush.msra.mxu0 %v103_v8  ;;  %226 = vmatpush.msra.mxu3 %v199_v19  ;;  %v197_v25 = vld [vmem:[#allocation8 + $0xe0] sm:$0xff]  ;;  %v196_v29 = vld [vmem:[#allocation8 + $0xd8] sm:$0xff]  ;;  %v91_v30 = vld [vmem:[#allocation5 + $0x50] sm:$0xff] }
  0x1e   :  { %137 = vmatpush.msra.mxu1 %v104_v9  ;;  %v93_v26 = vld [vmem:[#allocation5 + $0x60] sm:$0xff]  ;;  %v94_v27 = vld [vmem:[#allocation5 + $0x68] sm:$0xff]  ;;  %207 = vmatpush.msra.mxu2 %v182_v20  ;;  %v92_v31 = vld [vmem:[#allocation5 + $0x58] sm:$0xff] }
  0x1f   :  { %118 = vmatpush.msra.mxu0 %v101_v10  ;;  %227 = vmatpush.msra.mxu3 %v198_v21  ;;  %v179_v32 = vld [vmem:[#allocation8 + $0x50] sm:$0xff]  ;;  %v89_v34 = vld [vmem:[#allocation5 + $0x40] sm:$0xff]  ;;  %v90_v35 = vld [vmem:[#allocation5 + $0x48] sm:$0xff] }
  0x20   :  { %138 = vmatpush.msra.mxu1 %v102_v11  ;;  %208 = vmatpush.msra.mxu2 %v181_v24  ;;  %v195_v33 = vld [vmem:[#allocation8 + $0xd0] sm:$0xff]  ;;  %v178_v36 = vld [vmem:[#allocation8 + $0x48] sm:$0xff]  ;;  %v177_v40 = vld [vmem:[#allocation8 + $0x40] sm:$0xff] }
  0x21   :  { %119 = vmatpush.msra.mxu0 %v99_v12  ;;  %228 = vmatpush.msra.mxu3 %v197_v25  ;;  %v194_v37 = vld [vmem:[#allocation8 + $0xc8] sm:$0xff]  ;;  %v88_v39 = vld [vmem:[#allocation5 + $0x38] sm:$0xff]  ;;  %v85_v41 = vld [vmem:[#allocation5 + $0x20] sm:$0xff] }
  0x22   :  { %139 = vmatpush.msra.mxu1 %v100_v13  ;;  %209 = vmatpush.msra.mxu2 %v180_v28  ;;  %v87_v38 = vld [vmem:[#allocation5 + $0x30] sm:$0xff]  ;;  %v86_v42 = vld [vmem:[#allocation5 + $0x28] sm:$0xff]  ;;  %v84_v44 = vld [vmem:[#allocation5 + $0x18] sm:$0xff] }
  0x23   :  { %120 = vmatpush.msra.mxu0 %v97_v17  ;;  %229 = vmatpush.msra.mxu3 %v196_v29  ;;  %v83_v43 = vld [vmem:[#allocation5 + $0x10] sm:$0xff]  ;;  %v81_v45 = vld [vmem:[#allocation5] sm:$0xff]  ;;  %v82_v46 = vld [vmem:[#allocation5 + $0x8] sm:$0xff] }
  0x24   :  { %140 = vmatpush.msra.mxu1 %v98_v18  ;;  %210 = vmatpush.msra.mxu2 %v179_v32  ;;  %v80_v47 = vld [vmem:[#allocation2] sm:$0xff]  ;;  %v193_v49 = vld [vmem:[#allocation8 + $0xc0] sm:$0xff]  ;;  %v174_v52 = vld [vmem:[#allocation8 + $0x28] sm:$0xff] }
  0x25   :  { %121 = vmatpush.msra.mxu0 %v95_v22  ;;  %230 = vmatpush.msra.mxu3 %v195_v33  ;;  %v176_v48 = vld [vmem:[#allocation8 + $0x38] sm:$0xff]  ;;  %v175_v50 = vld [vmem:[#allocation8 + $0x30] sm:$0xff]  ;;  %v173_v54 = vld [vmem:[#allocation8 + $0x20] sm:$0xff] }
  0x26   :  { %141 = vmatpush.msra.mxu1 %v96_v23  ;;  %211 = vmatpush.msra.mxu2 %v178_v36  ;;  %v192_v51 = vld [vmem:[#allocation8 + $0xb8] sm:$0xff]  ;;  %v191_v53 = vld [vmem:[#allocation8 + $0xb0] sm:$0xff]  ;;  %v190_v55 = vld [vmem:[#allocation8 + $0xa8] sm:$0xff] }
  0x27   :  { %122 = vmatpush.msra.mxu0 %v93_v26  ;;  %231 = vmatpush.msra.mxu3 %v194_v37  ;;  %v172_v56 = vld [vmem:[#allocation8 + $0x18] sm:$0xff]  ;;  %v189_v57 = vld [vmem:[#allocation8 + $0xa0] sm:$0xff]  ;;  %v171_v58 = vld [vmem:[#allocation8 + $0x10] sm:$0xff] }
  0x28   :  { %142 = vmatpush.msra.mxu1 %v94_v27  ;;  %212 = vmatpush.msra.mxu2 %v177_v40  ;;  %v188_v59 = vld [vmem:[#allocation8 + $0x98] sm:$0xff]  ;;  %v170_v60 = vld [vmem:[#allocation8 + $0x8] sm:$0xff]  ;;  %v187_v61 = vld [vmem:[#allocation8 + $0x90] sm:$0xff] }
  0x29   :  { %123 = vmatpush.msra.mxu0 %v91_v30  ;;  %232 = vmatpush.msra.mxu3 %v193_v49  ;;  %v169_v62 = vld [vmem:[#allocation8] sm:$0xff]  ;;  %v186_v63 = vld [vmem:[#allocation8 + $0x88] sm:$0xff]  ;;  %v153_v1 = vld [vmem:[#allocation7] sm:$0x3] }
  0x2a   :  { %143 = vmatpush.msra.mxu1 %v92_v31  ;;  %213 = vmatpush.msra.mxu2 %v176_v48  ;;  %v185_v0 = vld [vmem:[#allocation8 + $0x80] sm:$0xff]  ;;  %v155_v2 = vperm.slane %v153_v1, 0  ;;  %v156_v3 = vperm.slane %v153_v1, 1  ;;  %v274_v16 = vld [vmem:[%s468_s4] ss:$0 sm:$0xff] }
  0x2b   :  { %124 = vmatpush.msra.mxu0 %v89_v34  ;;  %233 = vmatpush.msra.mxu3 %v192_v51 }
  0x2c   :  { %144 = vmatpush.msra.mxu1 %v90_v35  ;;  %214 = vmatpush.msra.mxu2 %v175_v50 }
  0x2d   :  { %125 = vmatpush.msra.mxu0 %v87_v38  ;;  %234 = vmatpush.msra.mxu3 %v191_v53 }
  0x2e   :  { %145 = vmatpush.msra.mxu1 %v88_v39  ;;  %215 = vmatpush.msra.mxu2 %v174_v52 }
  0x2f   :  { %126 = vmatpush.msra.mxu0 %v85_v41  ;;  %235 = vmatpush.msra.mxu3 %v190_v55 }
  0x30   :  { %146 = vmatpush.msra.mxu1 %v86_v42  ;;  %216 = vmatpush.msra.mxu2 %v173_v54 }
  0x31   :  { %127 = vmatpush.msra.mxu0 %v83_v43  ;;  %236 = vmatpush.msra.mxu3 %v189_v57 }
  0x32   :  { %147 = vmatpush.msra.mxu1 %v84_v44  ;;  %217 = vmatpush.msra.mxu2 %v172_v56 }
  0x33   :  { %128 = vmatpush.msra.mxu0 %v81_v45  ;;  %237 = vmatpush.msra.mxu3 %v188_v59 }
  0x34   :  { %148 = vmatpush.msra.mxu1 %v82_v46  ;;  %129 = vmatmul.f32.vlgmr.msra.gmra.mxu0 %v80_v47 }
  0x35   :  { %149 = vmatmul.f32.vlgmr.msra.gmra.mxu1 %v80_v47  ;;  %218 = vmatpush.msra.mxu2 %v171_v58 }
  0x36   :  { %238 = vmatpush.msra.mxu3 %v187_v61 }
  0x37   :  { %219 = vmatpush.msra.mxu2 %v170_v60 }
  0x38   :  { %239 = vmatpush.msra.mxu3 %v186_v63 }
  0x39   :  { %220 = vmatpush.msra.mxu2 %v169_v62 }
  0x3a   :  { %240 = vmatpush.msra.mxu3 %v185_v0 }
  0xb1   :  { %v130_v4 = vpop.f32.mrf.mxu0 }
  0xb2   :  { %v150_v5 = vpop.f32.mrf.mxu1  ;;  %v159_v6 = vsub.f32 %v130_v4, %v155_v2 }
  0xb3   :  { %v160_v7 = vsub.f32 %v150_v5, %v156_v3 }
  0xb4   :  { %v161_v8 = vmul.f32 %v159_v6, %v159_v6 }
  0xb5   :  { %v162_v9 = vmul.f32 %v160_v7, %v160_v7 }
  0xb6   :  { %v163_v10 = vsub.f32 0.0, %v161_v8 }
  0xb7   :  { %v164_v11 = vsub.f32 0.0, %v162_v9 }
  0xb8   :  { %v165_v12 = vmul.f32 1.442695, %v163_v10 }
  0xb9   :  { %v167_v13 = vmul.f32 1.442695, %v164_v11 }
  0xba   :  { %275 = vpow2.f32 %v165_v12 }
  0xbb   :  { %277 = vpow2.f32 %v167_v13 }
  0xc0   :  { %v276_v14 = vpop.eup %275 }
  0xc1   :  { %v278_v15 = vpop.eup %277  ;;  %221 = vmatmul.f32.vlgmr.msra.gmra.mxu2 %v276_v14 }
  0xc2   :  { %241 = vmatmul.f32.vlgmr.msra.gmra.mxu3 %v278_v15 }
 0x144   :  { %v222_v17 = vpop.f32.mrf.mxu2 }
 0x145   :  { %v223_v18 = vadd.f32 %v274_v16, %v222_v17  ;;  %v242_v19 = vpop.f32.mrf.mxu3 }
 0x147   :  { %v243_v20 = vadd.f32 %v242_v19, %v223_v18 }
 0x149   :  { %245 = vst [vmem:[#allocation10] sm:$0xff] %v243_v20 }
 0x14a   :  { %256 = dma.vmem_to_hbm [thread:$0]  %s252_s16, 128, %s254_s19, [#allocation4]  }
 0x14b   :  { %405 = dma.done.wait [#allocation4], 128  }
 0x14c   :  { %406 = vsyncadd [#allocation4], 4294967168 }
 0x14d   :  { %261 = vsyncpa [#allocation3], 1 }
 0x14e   :  { %262 = vsyncpa [#allocation6], 1 }
 0x14f   :  { %263 = vsyncpa [#allocation9], 1 }
 0x150   :  { %264 = vsyncpa [#allocation4], 1 }

</bundles_post_ra>
